<compile_context>
chip_gen: v7x
topology: tpu7x:2x2x1
jax: 0.10.0
libtpu: 0.0.40
codegen_flags: <defaults>
</compile_context>

<pallas_src>
import math
import numpy as np
import jax
import jax.numpy as jnp
from jax.experimental import pallas as pl
from jax.experimental.pallas import tpu as pltpu

# ---------------- configuration (matches CustomCNN ctor) ----------------
MAP_WIDTH = 9        # W
MAP_HEIGHT = 22      # H
NUM_CHANNELS = 2     # C
OUTPUT_LABELS = 10
BATCH = 2

H_OUT1 = MAP_HEIGHT - 2          # 20: conv1 output height (kernel (3, W))
W_OUT2 = MAP_WIDTH - 1           # 8 : conv2 output width  (kernel (H, 2))
POOL1_OUT = 10                   # AdaptiveAvgPool2d((10, 1))
POOL2_OUT = 4                    # AdaptiveAvgPool2d((1, 4))
FC1_IN = 16 * POOL1_OUT + 16 * POOL2_OUT   # 224
BN_EPS = 1e-5

K1_SLAB = NUM_CHANNELS * MAP_WIDTH     # 18: conv1 per-dh contraction length
K2_SLAB = NUM_CHANNELS * MAP_HEIGHT    # 44: conv2 per-dw contraction length
LANES = 128

# --- packed bf16 parameter buffer row layout (sections 16-row aligned) ---
ROW_FC1W = 0        # (224,120) permuted fc1 weight, lanes 0:120 (rest zero)
ROW_FC2W = 224      # (120, 60) fc2 weight^T at rows 224:344, lanes 0:60
ROW_FC3W = 352      # ( 60, 10) fc3 weight^T at rows 352:412, lanes 0:10
ROW_VEC = 480       # 7 vector rows: g1, be1, g2, be2, bfc1, bfc2, bfc3
ROW_C1W = 496       # 3 conv1 slabs (18,16), one every C1_STRIDE rows
C1_STRIDE = 32
ROW_C2W = 592       # 2 conv2 slabs (44,16), one every C2_STRIDE rows
C2_STRIDE = 48
PK_ROWS = 704       # multiple of 16 (bf16 sublane tile)


def adaptive_windows(in_size, out_size):
    """Window boundaries used by torch AdaptiveAvgPool (1-D)."""
    return [(int(math.floor(i * in_size / out_size)),
             int(math.ceil((i + 1) * in_size / out_size)))
            for i in range(out_size)]


# ------------------------------ kernel ----------------------------------
def make_kernel(n, pool1_wins, pool2_wins):
    f32 = jnp.float32
    bf16 = jnp.bfloat16
    m1_rows = H_OUT1 * n                      # rows of conv1 output (h*n + b)
    m2_rows = W_OUT2 * n                      # rows of conv2 output (w*n + b)
    inv_cnt1 = 1.0 / float(m1_rows)
    inv_cnt2 = 1.0 / float(m2_rows)

    def kernel(x1_ref, x2_ref, pk_ref, out_ref):
        def dot(a, b):
            return jnp.dot(a, b, preferred_element_type=f32)

        # ---- parameters, sliced out of the single packed bf16 buffer ----
        vec = pk_ref[ROW_VEC:ROW_VEC + 8, :].astype(f32)          # (8, 128)
        g1, be1 = vec[0:1, 0:16], vec[1:2, 0:16]
        g2, be2 = vec[2:3, 0:16], vec[3:4, 0:16]
        bfc1, bfc2, bfc3 = vec[4:5, :], vec[5:6, :], vec[6:7, :]

        # ---- conv1: sum of 3 shifted-row-block matmuls (in-kernel im2col) --
        # c1[h*n+b, o] = sum_dh xT1[(h+dh)*n+b, :] . w1_slab_dh[:, o]
        x1 = x1_ref[...]                                          # (H*n, C*W)
        c1 = dot(x1[0:m1_rows, :],
                 pk_ref[ROW_C1W:ROW_C1W + K1_SLAB, 0:16].astype(f32))
        for dh in (1, 2):
            r = ROW_C1W + C1_STRIDE * dh
            c1 = c1 + dot(x1[dh * n:dh * n + m1_rows, :],
                          pk_ref[r:r + K1_SLAB, 0:16].astype(f32))

        # ---- conv2: sum of 2 shifted-row-block matmuls ----
        x2 = x2_ref[...]                                          # (W*n, C*H)
        c2 = dot(x2[0:m2_rows, :],
                 pk_ref[ROW_C2W:ROW_C2W + K2_SLAB, 0:16].astype(f32))
        r2 = ROW_C2W + C2_STRIDE
        c2 = c2 + dot(x2[n:n + m2_rows, :],
                      pk_ref[r2:r2 + K2_SLAB, 0:16].astype(f32))
        # (conv biases omitted on purpose: they cancel in train-mode BN)

        # ---- BatchNorm2d, training-mode batch stats (one-pass variance) ----
        mu1 = jnp.sum(c1, axis=0, keepdims=True) * inv_cnt1
        var1 = jnp.sum(c1 * c1, axis=0, keepdims=True) * inv_cnt1 - mu1 * mu1
        a1 = g1 * jax.lax.rsqrt(var1 + BN_EPS)                    # scale
        d1 = be1 - a1 * mu1                                       # shift

        mu2 = jnp.sum(c2, axis=0, keepdims=True) * inv_cnt2
        var2 = jnp.sum(c2 * c2, axis=0, keepdims=True) * inv_cnt2 - mu2 * mu2
        a2 = g2 * jax.lax.rsqrt(var2 + BN_EPS)
        d2 = be2 - a2 * mu2

        # ---- adaptive avg pool + BN affine + flatten + concat, in vregs ----
        # Pooling is a mean, so it commutes with the per-channel BN affine:
        # apply (a, d) to the 14 pooled (n,16) tiles instead of 56 conv rows.
        tiles = []
        for (lo, hi) in pool1_wins:
            acc = c1[lo * n:(lo + 1) * n, :]
            for h in range(lo + 1, hi):
                acc = acc + c1[h * n:(h + 1) * n, :]
            tiles.append(acc * (a1 * (1.0 / (hi - lo))) + d1)
        for (lo, hi) in pool2_wins:
            acc = c2[lo * n:(lo + 1) * n, :]
            for w in range(lo + 1, hi):
                acc = acc + c2[w * n:(w + 1) * n, :]
            tiles.append(acc * (a2 * (1.0 / (hi - lo))) + d2)
        z = jnp.concatenate(tiles, axis=1)                        # (n, 224)

        # ---- fc1 -> relu -> fc2 -> relu -> fc3 (zero-padded to 128 lanes) --
        wa = pk_ref[ROW_FC1W:ROW_FC1W + FC1_IN, :]                # (224,128)
        wf2 = pk_ref[ROW_FC2W:ROW_FC2W + LANES, :]                # (128,128)
        wf3 = pk_ref[ROW_FC3W:ROW_FC3W + LANES, :]                # (128,128)
        h1 = jnp.maximum(dot(z.astype(bf16), wa) + bfc1, 0.0)     # (n,128)
        h2 = jnp.maximum(dot(h1.astype(bf16), wf2) + bfc2, 0.0)   # (n,128)
        out_ref[...] = dot(h2.astype(bf16), wf3) + bfc3           # :10 valid

    return kernel


# --------------------- host-side parameter packing -----------------------
def pack_params(p):
    """Pack all needed parameters into one (704,128) bf16 buffer (one DMA)."""
    f32 = jnp.float32
    fc1_w = p['fc1_w'].astype(f32)                                # (120, 224)
    # torch flatten order is channel-major (c*POOL + t); reorder to tile-major
    # (t*16 + c) so the pooled tiles can be consumed in concat order.
    wa1 = jnp.transpose(fc1_w[:, :16 * POOL1_OUT].reshape(120, 16, POOL1_OUT),
                        (2, 1, 0)).reshape(16 * POOL1_OUT, 120)
    wa2 = jnp.transpose(fc1_w[:, 16 * POOL1_OUT:].reshape(120, 16, POOL2_OUT),
                        (2, 1, 0)).reshape(16 * POOL2_OUT, 120)

    pk = jnp.zeros((PK_ROWS, LANES), f32)
    pk = pk.at[ROW_FC1W:ROW_FC1W + FC1_IN, 0:120].set(
        jnp.concatenate([wa1, wa2], axis=0))
    pk = pk.at[ROW_FC2W:ROW_FC2W + 120, 0:60].set(p['fc2_w'].T.astype(f32))
    pk = pk.at[ROW_FC3W:ROW_FC3W + 60, 0:OUTPUT_LABELS].set(p['fc3_w'].T.astype(f32))
    pk = pk.at[ROW_VEC + 0, 0:16].set(p['bn1_g'])
    pk = pk.at[ROW_VEC + 1, 0:16].set(p['bn1_b'])
    pk = pk.at[ROW_VEC + 2, 0:16].set(p['bn2_g'])
    pk = pk.at[ROW_VEC + 3, 0:16].set(p['bn2_b'])
    pk = pk.at[ROW_VEC + 4, 0:120].set(p['fc1_b'])
    pk = pk.at[ROW_VEC + 5, 0:60].set(p['fc2_b'])
    pk = pk.at[ROW_VEC + 6, 0:OUTPUT_LABELS].set(p['fc3_b'])
    # conv1 per-dh weight slabs: slab_dh[c*W + w, o] = conv1_w[o, c, dh, w]
    for dh in range(3):
        slab = p['conv1_w'][:, :, dh, :].reshape(16, -1).T.astype(f32)  # (18,16)
        r = ROW_C1W + C1_STRIDE * dh
        pk = pk.at[r:r + K1_SLAB, 0:16].set(slab)
    # conv2 per-dw weight slabs: slab_dw[c*H + h, o] = conv2_w[o, c, h, dw]
    for dw in range(2):
        slab = p['conv2_w'][:, :, :, dw].reshape(16, -1).T.astype(f32)  # (44,16)
        r = ROW_C2W + C2_STRIDE * dw
        pk = pk.at[r:r + K2_SLAB, 0:16].set(slab)
    # bf16 halves the dominant parameter DMA; default MXU precision truncates
    # operands to bf16 anyway, accumulation stays f32 in-kernel.
    return pk.astype(jnp.bfloat16)


# ----------------------------- wrapper -----------------------------------
def custom_cnn_forward(x, pk):
    n, c, hgt, wid = x.shape
    assert (c, hgt, wid) == (NUM_CHANNELS, MAP_HEIGHT, MAP_WIDTH)
    f32 = jnp.float32
    x = x.astype(f32)

    # Two single-transpose views replace the old ~30-op host-side im2col:
    #   xT1[h*n + b, c*W + w] = x[b, c, h, w]   -> conv1 shifted-slab dots
    #   xT2[w*n + b, c*H + h] = x[b, c, h, w]   -> conv2 shifted-slab dots
    xT1 = jnp.transpose(x, (2, 0, 1, 3)).reshape(hgt * n, NUM_CHANNELS * wid)
    xT2 = jnp.transpose(x, (3, 0, 1, 2)).reshape(wid * n, NUM_CHANNELS * hgt)

    pool1_wins = adaptive_windows(H_OUT1, POOL1_OUT)
    pool2_wins = adaptive_windows(W_OUT2, POOL2_OUT)

    vmem = pl.BlockSpec(memory_space=pltpu.MemorySpace.VMEM)
    out = pl.pallas_call(
        make_kernel(n, pool1_wins, pool2_wins),
        out_shape=jax.ShapeDtypeStruct((n, LANES), f32),
        in_specs=[vmem, vmem, vmem],
        out_specs=vmem,
    )(xT1, xT2, pk)
    return out[:, :OUTPUT_LABELS]


# ---------------------- pure-JAX reference (check) -----------------------
def adaptive_avg_pool2d(x, out_hw):
    n, c, h, w = x.shape
    hw = adaptive_windows(h, out_hw[0])
    ww = adaptive_windows(w, out_hw[1])
    rows = []
    for (hl, hh) in hw:
        cols = [jnp.mean(x[:, :, hl:hh, wl:wh], axis=(2, 3)) for (wl, wh) in ww]
        rows.append(jnp.stack(cols, axis=-1))
    return jnp.stack(rows, axis=-2)


def reference_forward(x, p):
    def conv(inp, w, b):
        y = jax.lax.conv_general_dilated(
            inp, w, (1, 1), 'VALID',
            dimension_numbers=('NCHW', 'OIHW', 'NCHW'),
            precision=jax.lax.Precision.HIGHEST)
        return y + b[None, :, None, None]

    def bn_train(y, g, be):
        m = jnp.mean(y, axis=(0, 2, 3), keepdims=True)
        v = jnp.mean((y - m) ** 2, axis=(0, 2, 3), keepdims=True)
        return (y - m) / jnp.sqrt(v + BN_EPS) * g[None, :, None, None] \
            + be[None, :, None, None]

    n = x.shape[0]
    x1 = adaptive_avg_pool2d(bn_train(conv(x, p['conv1_w'], p['conv1_b']),
                                      p['bn1_g'], p['bn1_b']),
                             (POOL1_OUT, 1)).reshape(n, -1)
    x2 = adaptive_avg_pool2d(bn_train(conv(x, p['conv2_w'], p['conv2_b']),
                                      p['bn2_g'], p['bn2_b']),
                             (1, POOL2_OUT)).reshape(n, -1)
    z = jnp.concatenate([x1, x2], axis=1)
    z = jnp.maximum(z @ p['fc1_w'].T + p['fc1_b'], 0.0)
    z = jnp.maximum(z @ p['fc2_w'].T + p['fc2_b'], 0.0)
    return z @ p['fc3_w'].T + p['fc3_b']


# ------------------------------- main ------------------------------------
def init_params(key):
    ks = jax.random.split(key, 14)
    p = {
        'conv1_w': 0.1 * jax.random.normal(ks[0], (16, NUM_CHANNELS, 3, MAP_WIDTH)),
        'conv1_b': 0.1 * jax.random.normal(ks[1], (16,)),
        'bn1_g':   1.0 + 0.1 * jax.random.normal(ks[2], (16,)),
        'bn1_b':   0.1 * jax.random.normal(ks[3], (16,)),
        'conv2_w': 0.1 * jax.random.normal(ks[4], (16, NUM_CHANNELS, MAP_HEIGHT, 2)),
        'conv2_b': 0.1 * jax.random.normal(ks[5], (16,)),
        'bn2_g':   1.0 + 0.1 * jax.random.normal(ks[6], (16,)),
        'bn2_b':   0.1 * jax.random.normal(ks[7], (16,)),
        'fc1_w':   0.05 * jax.random.normal(ks[8], (120, FC1_IN)),
        'fc1_b':   0.05 * jax.random.normal(ks[9], (120,)),
        'fc2_w':   0.05 * jax.random.normal(ks[10], (60, 120)),
        'fc2_b':   0.05 * jax.random.normal(ks[11], (60,)),
        'fc3_w':   0.05 * jax.random.normal(ks[12], (OUTPUT_LABELS, 60)),
        'fc3_b':   0.05 * jax.random.normal(ks[13], (OUTPUT_LABELS,)),
    }
    return jax.tree_util.tree_map(lambda a: a.astype(jnp.float32), p)


if __name__ == "__main__":
    key = jax.random.PRNGKey(0)
    pkey, xkey = jax.random.split(key)
    params = init_params(pkey)
    x = jax.random.normal(xkey, (BATCH, NUM_CHANNELS, MAP_HEIGHT, MAP_WIDTH),
                          dtype=jnp.float32)

    pk = pack_params(params)            # one-time host-side parameter packing
    fwd = jax.jit(custom_cnn_forward)
    out = jax.block_until_ready(fwd(x, pk))

    ref = jax.block_until_ready(reference_forward(x, params))
    assert out.shape == (BATCH, OUTPUT_LABELS)
    np.testing.assert_allclose(np.asarray(out), np.asarray(ref),
                               rtol=5e-2, atol=5e-2)
    print("KERNEL_OK")
</pallas_src>

<mosaic_0001>
module attributes {stable_mosaic.version = 11 : i64} {
  func.func @kernel(%arg0: memref<44x18xf32, #tpu.memory_space<vmem>>, %arg1: memref<18x44xf32, #tpu.memory_space<vmem>>, %arg2: memref<704x128xbf16, #tpu.memory_space<vmem>>, %arg3: memref<2x128xf32, #tpu.memory_space<vmem>>) attributes {dimension_semantics = [], scalar_prefetch = 0 : i64, scratch_operands = 0 : i64, tpu.core_type = #tpu.core_type<tc>} {
    %c480 = arith.constant 480 : index
    %c0 = arith.constant 0 : index
    %0 = vector.load %arg2[%c480, %c0] : memref<704x128xbf16, #tpu.memory_space<vmem>>, vector<8x128xbf16>
    %1 = arith.extf %0 : vector<8x128xbf16> to vector<8x128xf32>
    %2 = vector.extract_strided_slice %1 {offsets = [0, 0], sizes = [1, 16], strides = [1, 1]} : vector<8x128xf32> to vector<1x16xf32>
    %3 = vector.extract_strided_slice %1 {offsets = [1, 0], sizes = [1, 16], strides = [1, 1]} : vector<8x128xf32> to vector<1x16xf32>
    %4 = vector.extract_strided_slice %1 {offsets = [2, 0], sizes = [1, 16], strides = [1, 1]} : vector<8x128xf32> to vector<1x16xf32>
    %5 = vector.extract_strided_slice %1 {offsets = [3, 0], sizes = [1, 16], strides = [1, 1]} : vector<8x128xf32> to vector<1x16xf32>
    %6 = vector.extract_strided_slice %1 {offsets = [4, 0], sizes = [1, 128], strides = [1, 1]} : vector<8x128xf32> to vector<1x128xf32>
    %7 = vector.extract_strided_slice %1 {offsets = [5, 0], sizes = [1, 128], strides = [1, 1]} : vector<8x128xf32> to vector<1x128xf32>
    %8 = vector.extract_strided_slice %1 {offsets = [6, 0], sizes = [1, 128], strides = [1, 1]} : vector<8x128xf32> to vector<1x128xf32>
    %c0_0 = arith.constant 0 : index
    %c0_1 = arith.constant 0 : index
    %9 = vector.load %arg0[%c0_0, %c0_1] : memref<44x18xf32, #tpu.memory_space<vmem>>, vector<44x18xf32>
    %10 = vector.extract_strided_slice %9 {offsets = [0, 0], sizes = [40, 18], strides = [1, 1]} : vector<44x18xf32> to vector<40x18xf32>
    %c496 = arith.constant 496 : index
    %c0_2 = arith.constant 0 : index
    %11 = vector.load %arg2[%c496, %c0_2] : memref<704x128xbf16, #tpu.memory_space<vmem>>, vector<18x16xbf16>
    %12 = arith.extf %11 : vector<18x16xbf16> to vector<18x16xf32>
    %cst = arith.constant dense<0.000000e+00> : vector<40x16xf32>
    %13 = tpu.matmul %10, %12, %cst {dimension_numbers = #tpu.dot_dimension_numbers<[1], [0], [0], [1], [0, 0, 1, 1], [], []>} : vector<40x18xf32>, vector<18x16xf32>, vector<40x16xf32> -> vector<40x16xf32>
    %14 = vector.extract_strided_slice %9 {offsets = [2, 0], sizes = [40, 18], strides = [1, 1]} : vector<44x18xf32> to vector<40x18xf32>
    %c528 = arith.constant 528 : index
    %c0_3 = arith.constant 0 : index
    %15 = vector.load %arg2[%c528, %c0_3] : memref<704x128xbf16, #tpu.memory_space<vmem>>, vector<18x16xbf16>
    %16 = arith.extf %15 : vector<18x16xbf16> to vector<18x16xf32>
    %cst_4 = arith.constant dense<0.000000e+00> : vector<40x16xf32>
    %17 = tpu.matmul %14, %16, %cst_4 {dimension_numbers = #tpu.dot_dimension_numbers<[1], [0], [0], [1], [0, 0, 1, 1], [], []>} : vector<40x18xf32>, vector<18x16xf32>, vector<40x16xf32> -> vector<40x16xf32>
    %18 = arith.addf %13, %17 : vector<40x16xf32>
    %19 = vector.extract_strided_slice %9 {offsets = [4, 0], sizes = [40, 18], strides = [1, 1]} : vector<44x18xf32> to vector<40x18xf32>
    %c560 = arith.constant 560 : index
    %c0_5 = arith.constant 0 : index
    %20 = vector.load %arg2[%c560, %c0_5] : memref<704x128xbf16, #tpu.memory_space<vmem>>, vector<18x16xbf16>
    %21 = arith.extf %20 : vector<18x16xbf16> to vector<18x16xf32>
    %cst_6 = arith.constant dense<0.000000e+00> : vector<40x16xf32>
    %22 = tpu.matmul %19, %21, %cst_6 {dimension_numbers = #tpu.dot_dimension_numbers<[1], [0], [0], [1], [0, 0, 1, 1], [], []>} : vector<40x18xf32>, vector<18x16xf32>, vector<40x16xf32> -> vector<40x16xf32>
    %23 = arith.addf %18, %22 : vector<40x16xf32>
    %c0_7 = arith.constant 0 : index
    %c0_8 = arith.constant 0 : index
    %24 = vector.load %arg1[%c0_7, %c0_8] : memref<18x44xf32, #tpu.memory_space<vmem>>, vector<18x44xf32>
    %25 = vector.extract_strided_slice %24 {offsets = [0, 0], sizes = [16, 44], strides = [1, 1]} : vector<18x44xf32> to vector<16x44xf32>
    %c592 = arith.constant 592 : index
    %c0_9 = arith.constant 0 : index
    %26 = vector.load %arg2[%c592, %c0_9] : memref<704x128xbf16, #tpu.memory_space<vmem>>, vector<44x16xbf16>
    %27 = arith.extf %26 : vector<44x16xbf16> to vector<44x16xf32>
    %cst_10 = arith.constant dense<0.000000e+00> : vector<16x16xf32>
    %28 = tpu.matmul %25, %27, %cst_10 {dimension_numbers = #tpu.dot_dimension_numbers<[1], [0], [0], [1], [0, 0, 1, 1], [], []>} : vector<16x44xf32>, vector<44x16xf32>, vector<16x16xf32> -> vector<16x16xf32>
    %29 = vector.extract_strided_slice %24 {offsets = [2, 0], sizes = [16, 44], strides = [1, 1]} : vector<18x44xf32> to vector<16x44xf32>
    %c640 = arith.constant 640 : index
    %c0_11 = arith.constant 0 : index
    %30 = vector.load %arg2[%c640, %c0_11] : memref<704x128xbf16, #tpu.memory_space<vmem>>, vector<44x16xbf16>
    %31 = arith.extf %30 : vector<44x16xbf16> to vector<44x16xf32>
    %cst_12 = arith.constant dense<0.000000e+00> : vector<16x16xf32>
    %32 = tpu.matmul %29, %31, %cst_12 {dimension_numbers = #tpu.dot_dimension_numbers<[1], [0], [0], [1], [0, 0, 1, 1], [], []>} : vector<16x44xf32>, vector<44x16xf32>, vector<16x16xf32> -> vector<16x16xf32>
    %33 = arith.addf %28, %32 : vector<16x16xf32>
    %cst_13 = arith.constant dense<0.000000e+00> : vector<16xf32>
    %34 = vector.multi_reduction <add>, %23, %cst_13 [0] : vector<40x16xf32> to vector<16xf32>
    %35 = vector.shape_cast %34 : vector<16xf32> to vector<1x16xf32>
    %cst_14 = arith.constant 2.500000e-02 : f32
    %36 = vector.broadcast %cst_14 : f32 to vector<1x16xf32>
    %37 = arith.mulf %35, %36 : vector<1x16xf32>
    %38 = arith.mulf %23, %23 : vector<40x16xf32>
    %cst_15 = arith.constant dense<0.000000e+00> : vector<16xf32>
    %39 = vector.multi_reduction <add>, %38, %cst_15 [0] : vector<40x16xf32> to vector<16xf32>
    %40 = vector.shape_cast %39 : vector<16xf32> to vector<1x16xf32>
    %cst_16 = arith.constant 2.500000e-02 : f32
    %41 = vector.broadcast %cst_16 : f32 to vector<1x16xf32>
    %42 = arith.mulf %40, %41 : vector<1x16xf32>
    %43 = arith.mulf %37, %37 : vector<1x16xf32>
    %44 = arith.subf %42, %43 : vector<1x16xf32>
    %cst_17 = arith.constant 9.99999974E-6 : f32
    %45 = vector.broadcast %cst_17 : f32 to vector<1x16xf32>
    %46 = arith.addf %44, %45 : vector<1x16xf32>
    %47 = math.rsqrt %46 : vector<1x16xf32>
    %48 = arith.mulf %2, %47 : vector<1x16xf32>
    %49 = arith.mulf %48, %37 : vector<1x16xf32>
    %50 = arith.subf %3, %49 : vector<1x16xf32>
    %cst_18 = arith.constant dense<0.000000e+00> : vector<16xf32>
    %51 = vector.multi_reduction <add>, %33, %cst_18 [0] : vector<16x16xf32> to vector<16xf32>
    %52 = vector.shape_cast %51 : vector<16xf32> to vector<1x16xf32>
    %cst_19 = arith.constant 6.250000e-02 : f32
    %53 = vector.broadcast %cst_19 : f32 to vector<1x16xf32>
    %54 = arith.mulf %52, %53 : vector<1x16xf32>
    %55 = arith.mulf %33, %33 : vector<16x16xf32>
    %cst_20 = arith.constant dense<0.000000e+00> : vector<16xf32>
    %56 = vector.multi_reduction <add>, %55, %cst_20 [0] : vector<16x16xf32> to vector<16xf32>
    %57 = vector.shape_cast %56 : vector<16xf32> to vector<1x16xf32>
    %cst_21 = arith.constant 6.250000e-02 : f32
    %58 = vector.broadcast %cst_21 : f32 to vector<1x16xf32>
    %59 = arith.mulf %57, %58 : vector<1x16xf32>
    %60 = arith.mulf %54, %54 : vector<1x16xf32>
    %61 = arith.subf %59, %60 : vector<1x16xf32>
    %cst_22 = arith.constant 9.99999974E-6 : f32
    %62 = vector.broadcast %cst_22 : f32 to vector<1x16xf32>
    %63 = arith.addf %61, %62 : vector<1x16xf32>
    %64 = math.rsqrt %63 : vector<1x16xf32>
    %65 = arith.mulf %4, %64 : vector<1x16xf32>
    %66 = arith.mulf %65, %54 : vector<1x16xf32>
    %67 = arith.subf %5, %66 : vector<1x16xf32>
    %68 = vector.extract_strided_slice %23 {offsets = [0, 0], sizes = [2, 16], strides = [1, 1]} : vector<40x16xf32> to vector<2x16xf32>
    %69 = vector.extract_strided_slice %23 {offsets = [2, 0], sizes = [2, 16], strides = [1, 1]} : vector<40x16xf32> to vector<2x16xf32>
    %70 = arith.addf %68, %69 : vector<2x16xf32>
    %cst_23 = arith.constant 5.000000e-01 : f32
    %71 = vector.broadcast %cst_23 : f32 to vector<1x16xf32>
    %72 = arith.mulf %48, %71 : vector<1x16xf32>
    %73 = vector.broadcast %72 : vector<1x16xf32> to vector<2x16xf32>
    %74 = arith.mulf %70, %73 : vector<2x16xf32>
    %75 = vector.broadcast %50 : vector<1x16xf32> to vector<2x16xf32>
    %76 = arith.addf %74, %75 : vector<2x16xf32>
    %77 = vector.extract_strided_slice %23 {offsets = [4, 0], sizes = [2, 16], strides = [1, 1]} : vector<40x16xf32> to vector<2x16xf32>
    %78 = vector.extract_strided_slice %23 {offsets = [6, 0], sizes = [2, 16], strides = [1, 1]} : vector<40x16xf32> to vector<2x16xf32>
    %79 = arith.addf %77, %78 : vector<2x16xf32>
    %cst_24 = arith.constant 5.000000e-01 : f32
    %80 = vector.broadcast %cst_24 : f32 to vector<1x16xf32>
    %81 = arith.mulf %48, %80 : vector<1x16xf32>
    %82 = vector.broadcast %81 : vector<1x16xf32> to vector<2x16xf32>
    %83 = arith.mulf %79, %82 : vector<2x16xf32>
    %84 = vector.broadcast %50 : vector<1x16xf32> to vector<2x16xf32>
    %85 = arith.addf %83, %84 : vector<2x16xf32>
    %86 = vector.extract_strided_slice %23 {offsets = [8, 0], sizes = [2, 16], strides = [1, 1]} : vector<40x16xf32> to vector<2x16xf32>
    %87 = vector.extract_strided_slice %23 {offsets = [10, 0], sizes = [2, 16], strides = [1, 1]} : vector<40x16xf32> to vector<2x16xf32>
    %88 = arith.addf %86, %87 : vector<2x16xf32>
    %cst_25 = arith.constant 5.000000e-01 : f32
    %89 = vector.broadcast %cst_25 : f32 to vector<1x16xf32>
    %90 = arith.mulf %48, %89 : vector<1x16xf32>
    %91 = vector.broadcast %90 : vector<1x16xf32> to vector<2x16xf32>
    %92 = arith.mulf %88, %91 : vector<2x16xf32>
    %93 = vector.broadcast %50 : vector<1x16xf32> to vector<2x16xf32>
    %94 = arith.addf %92, %93 : vector<2x16xf32>
    %95 = vector.extract_strided_slice %23 {offsets = [12, 0], sizes = [2, 16], strides = [1, 1]} : vector<40x16xf32> to vector<2x16xf32>
    %96 = vector.extract_strided_slice %23 {offsets = [14, 0], sizes = [2, 16], strides = [1, 1]} : vector<40x16xf32> to vector<2x16xf32>
    %97 = arith.addf %95, %96 : vector<2x16xf32>
    %cst_26 = arith.constant 5.000000e-01 : f32
    %98 = vector.broadcast %cst_26 : f32 to vector<1x16xf32>
    %99 = arith.mulf %48, %98 : vector<1x16xf32>
    %100 = vector.broadcast %99 : vector<1x16xf32> to vector<2x16xf32>
    %101 = arith.mulf %97, %100 : vector<2x16xf32>
    %102 = vector.broadcast %50 : vector<1x16xf32> to vector<2x16xf32>
    %103 = arith.addf %101, %102 : vector<2x16xf32>
    %104 = vector.extract_strided_slice %23 {offsets = [16, 0], sizes = [2, 16], strides = [1, 1]} : vector<40x16xf32> to vector<2x16xf32>
    %105 = vector.extract_strided_slice %23 {offsets = [18, 0], sizes = [2, 16], strides = [1, 1]} : vector<40x16xf32> to vector<2x16xf32>
    %106 = arith.addf %104, %105 : vector<2x16xf32>
    %cst_27 = arith.constant 5.000000e-01 : f32
    %107 = vector.broadcast %cst_27 : f32 to vector<1x16xf32>
    %108 = arith.mulf %48, %107 : vector<1x16xf32>
    %109 = vector.broadcast %108 : vector<1x16xf32> to vector<2x16xf32>
    %110 = arith.mulf %106, %109 : vector<2x16xf32>
    %111 = vector.broadcast %50 : vector<1x16xf32> to vector<2x16xf32>
    %112 = arith.addf %110, %111 : vector<2x16xf32>
    %113 = vector.extract_strided_slice %23 {offsets = [20, 0], sizes = [2, 16], strides = [1, 1]} : vector<40x16xf32> to vector<2x16xf32>
    %114 = vector.extract_strided_slice %23 {offsets = [22, 0], sizes = [2, 16], strides = [1, 1]} : vector<40x16xf32> to vector<2x16xf32>
    %115 = arith.addf %113, %114 : vector<2x16xf32>
    %cst_28 = arith.constant 5.000000e-01 : f32
    %116 = vector.broadcast %cst_28 : f32 to vector<1x16xf32>
    %117 = arith.mulf %48, %116 : vector<1x16xf32>
    %118 = vector.broadcast %117 : vector<1x16xf32> to vector<2x16xf32>
    %119 = arith.mulf %115, %118 : vector<2x16xf32>
    %120 = vector.broadcast %50 : vector<1x16xf32> to vector<2x16xf32>
    %121 = arith.addf %119, %120 : vector<2x16xf32>
    %122 = vector.extract_strided_slice %23 {offsets = [24, 0], sizes = [2, 16], strides = [1, 1]} : vector<40x16xf32> to vector<2x16xf32>
    %123 = vector.extract_strided_slice %23 {offsets = [26, 0], sizes = [2, 16], strides = [1, 1]} : vector<40x16xf32> to vector<2x16xf32>
    %124 = arith.addf %122, %123 : vector<2x16xf32>
    %cst_29 = arith.constant 5.000000e-01 : f32
    %125 = vector.broadcast %cst_29 : f32 to vector<1x16xf32>
    %126 = arith.mulf %48, %125 : vector<1x16xf32>
    %127 = vector.broadcast %126 : vector<1x16xf32> to vector<2x16xf32>
    %128 = arith.mulf %124, %127 : vector<2x16xf32>
    %129 = vector.broadcast %50 : vector<1x16xf32> to vector<2x16xf32>
    %130 = arith.addf %128, %129 : vector<2x16xf32>
    %131 = vector.extract_strided_slice %23 {offsets = [28, 0], sizes = [2, 16], strides = [1, 1]} : vector<40x16xf32> to vector<2x16xf32>
    %132 = vector.extract_strided_slice %23 {offsets = [30, 0], sizes = [2, 16], strides = [1, 1]} : vector<40x16xf32> to vector<2x16xf32>
    %133 = arith.addf %131, %132 : vector<2x16xf32>
    %cst_30 = arith.constant 5.000000e-01 : f32
    %134 = vector.broadcast %cst_30 : f32 to vector<1x16xf32>
    %135 = arith.mulf %48, %134 : vector<1x16xf32>
    %136 = vector.broadcast %135 : vector<1x16xf32> to vector<2x16xf32>
    %137 = arith.mulf %133, %136 : vector<2x16xf32>
    %138 = vector.broadcast %50 : vector<1x16xf32> to vector<2x16xf32>
    %139 = arith.addf %137, %138 : vector<2x16xf32>
    %140 = vector.extract_strided_slice %23 {offsets = [32, 0], sizes = [2, 16], strides = [1, 1]} : vector<40x16xf32> to vector<2x16xf32>
    %141 = vector.extract_strided_slice %23 {offsets = [34, 0], sizes = [2, 16], strides = [1, 1]} : vector<40x16xf32> to vector<2x16xf32>
    %142 = arith.addf %140, %141 : vector<2x16xf32>
    %cst_31 = arith.constant 5.000000e-01 : f32
    %143 = vector.broadcast %cst_31 : f32 to vector<1x16xf32>
    %144 = arith.mulf %48, %143 : vector<1x16xf32>
    %145 = vector.broadcast %144 : vector<1x16xf32> to vector<2x16xf32>
    %146 = arith.mulf %142, %145 : vector<2x16xf32>
    %147 = vector.broadcast %50 : vector<1x16xf32> to vector<2x16xf32>
    %148 = arith.addf %146, %147 : vector<2x16xf32>
    %149 = vector.extract_strided_slice %23 {offsets = [36, 0], sizes = [2, 16], strides = [1, 1]} : vector<40x16xf32> to vector<2x16xf32>
    %150 = vector.extract_strided_slice %23 {offsets = [38, 0], sizes = [2, 16], strides = [1, 1]} : vector<40x16xf32> to vector<2x16xf32>
    %151 = arith.addf %149, %150 : vector<2x16xf32>
    %cst_32 = arith.constant 5.000000e-01 : f32
    %152 = vector.broadcast %cst_32 : f32 to vector<1x16xf32>
    %153 = arith.mulf %48, %152 : vector<1x16xf32>
    %154 = vector.broadcast %153 : vector<1x16xf32> to vector<2x16xf32>
    %155 = arith.mulf %151, %154 : vector<2x16xf32>
    %156 = vector.broadcast %50 : vector<1x16xf32> to vector<2x16xf32>
    %157 = arith.addf %155, %156 : vector<2x16xf32>
    %158 = vector.extract_strided_slice %33 {offsets = [0, 0], sizes = [2, 16], strides = [1, 1]} : vector<16x16xf32> to vector<2x16xf32>
    %159 = vector.extract_strided_slice %33 {offsets = [2, 0], sizes = [2, 16], strides = [1, 1]} : vector<16x16xf32> to vector<2x16xf32>
    %160 = arith.addf %158, %159 : vector<2x16xf32>
    %cst_33 = arith.constant 5.000000e-01 : f32
    %161 = vector.broadcast %cst_33 : f32 to vector<1x16xf32>
    %162 = arith.mulf %65, %161 : vector<1x16xf32>
    %163 = vector.broadcast %162 : vector<1x16xf32> to vector<2x16xf32>
    %164 = arith.mulf %160, %163 : vector<2x16xf32>
    %165 = vector.broadcast %67 : vector<1x16xf32> to vector<2x16xf32>
    %166 = arith.addf %164, %165 : vector<2x16xf32>
    %167 = vector.extract_strided_slice %33 {offsets = [4, 0], sizes = [2, 16], strides = [1, 1]} : vector<16x16xf32> to vector<2x16xf32>
    %168 = vector.extract_strided_slice %33 {offsets = [6, 0], sizes = [2, 16], strides = [1, 1]} : vector<16x16xf32> to vector<2x16xf32>
    %169 = arith.addf %167, %168 : vector<2x16xf32>
    %cst_34 = arith.constant 5.000000e-01 : f32
    %170 = vector.broadcast %cst_34 : f32 to vector<1x16xf32>
    %171 = arith.mulf %65, %170 : vector<1x16xf32>
    %172 = vector.broadcast %171 : vector<1x16xf32> to vector<2x16xf32>
    %173 = arith.mulf %169, %172 : vector<2x16xf32>
    %174 = vector.broadcast %67 : vector<1x16xf32> to vector<2x16xf32>
    %175 = arith.addf %173, %174 : vector<2x16xf32>
    %176 = vector.extract_strided_slice %33 {offsets = [8, 0], sizes = [2, 16], strides = [1, 1]} : vector<16x16xf32> to vector<2x16xf32>
    %177 = vector.extract_strided_slice %33 {offsets = [10, 0], sizes = [2, 16], strides = [1, 1]} : vector<16x16xf32> to vector<2x16xf32>
    %178 = arith.addf %176, %177 : vector<2x16xf32>
    %cst_35 = arith.constant 5.000000e-01 : f32
    %179 = vector.broadcast %cst_35 : f32 to vector<1x16xf32>
    %180 = arith.mulf %65, %179 : vector<1x16xf32>
    %181 = vector.broadcast %180 : vector<1x16xf32> to vector<2x16xf32>
    %182 = arith.mulf %178, %181 : vector<2x16xf32>
    %183 = vector.broadcast %67 : vector<1x16xf32> to vector<2x16xf32>
    %184 = arith.addf %182, %183 : vector<2x16xf32>
    %185 = vector.extract_strided_slice %33 {offsets = [12, 0], sizes = [2, 16], strides = [1, 1]} : vector<16x16xf32> to vector<2x16xf32>
    %186 = vector.extract_strided_slice %33 {offsets = [14, 0], sizes = [2, 16], strides = [1, 1]} : vector<16x16xf32> to vector<2x16xf32>
    %187 = arith.addf %185, %186 : vector<2x16xf32>
    %cst_36 = arith.constant 5.000000e-01 : f32
    %188 = vector.broadcast %cst_36 : f32 to vector<1x16xf32>
    %189 = arith.mulf %65, %188 : vector<1x16xf32>
    %190 = vector.broadcast %189 : vector<1x16xf32> to vector<2x16xf32>
    %191 = arith.mulf %187, %190 : vector<2x16xf32>
    %192 = vector.broadcast %67 : vector<1x16xf32> to vector<2x16xf32>
    %193 = arith.addf %191, %192 : vector<2x16xf32>
    %194 = tpu.concatenate %76, %85, %94, %103, %112, %121, %130, %139, %148, %157, %166, %175, %184, %193 in 1 : vector<2x16xf32>, vector<2x16xf32>, vector<2x16xf32>, vector<2x16xf32>, vector<2x16xf32>, vector<2x16xf32>, vector<2x16xf32>, vector<2x16xf32>, vector<2x16xf32>, vector<2x16xf32>, vector<2x16xf32>, vector<2x16xf32>, vector<2x16xf32>, vector<2x16xf32> -> vector<2x224xf32>
    %c0_37 = arith.constant 0 : index
    %c0_38 = arith.constant 0 : index
    %195 = vector.load %arg2[%c0_37, %c0_38] : memref<704x128xbf16, #tpu.memory_space<vmem>>, vector<224x128xbf16>
    %c224 = arith.constant 224 : index
    %c0_39 = arith.constant 0 : index
    %196 = vector.load %arg2[%c224, %c0_39] : memref<704x128xbf16, #tpu.memory_space<vmem>>, vector<128x128xbf16>
    %c352 = arith.constant 352 : index
    %c0_40 = arith.constant 0 : index
    %197 = vector.load %arg2[%c352, %c0_40] : memref<704x128xbf16, #tpu.memory_space<vmem>>, vector<128x128xbf16>
    %198 = arith.truncf %194 : vector<2x224xf32> to vector<2x224xbf16>
    %cst_41 = arith.constant dense<0.000000e+00> : vector<2x128xf32>
    %199 = tpu.matmul %198, %195, %cst_41 {dimension_numbers = #tpu.dot_dimension_numbers<[1], [0], [0], [1], [0, 0, 1, 1], [], []>} : vector<2x224xbf16>, vector<224x128xbf16>, vector<2x128xf32> -> vector<2x128xf32>
    %200 = vector.broadcast %6 : vector<1x128xf32> to vector<2x128xf32>
    %201 = arith.addf %199, %200 : vector<2x128xf32>
    %cst_42 = arith.constant 0.000000e+00 : f32
    %202 = vector.broadcast %cst_42 : f32 to vector<2x128xf32>
    %203 = arith.maximumf %201, %202 : vector<2x128xf32>
    %204 = arith.truncf %203 : vector<2x128xf32> to vector<2x128xbf16>
    %cst_43 = arith.constant dense<0.000000e+00> : vector<2x128xf32>
    %205 = tpu.matmul %204, %196, %cst_43 {dimension_numbers = #tpu.dot_dimension_numbers<[1], [0], [0], [1], [0, 0, 1, 1], [], []>} : vector<2x128xbf16>, vector<128x128xbf16>, vector<2x128xf32> -> vector<2x128xf32>
    %206 = vector.broadcast %7 : vector<1x128xf32> to vector<2x128xf32>
    %207 = arith.addf %205, %206 : vector<2x128xf32>
    %cst_44 = arith.constant 0.000000e+00 : f32
    %208 = vector.broadcast %cst_44 : f32 to vector<2x128xf32>
    %209 = arith.maximumf %207, %208 : vector<2x128xf32>
    %210 = arith.truncf %209 : vector<2x128xf32> to vector<2x128xbf16>
    %cst_45 = arith.constant dense<0.000000e+00> : vector<2x128xf32>
    %211 = tpu.matmul %210, %197, %cst_45 {dimension_numbers = #tpu.dot_dimension_numbers<[1], [0], [0], [1], [0, 0, 1, 1], [], []>} : vector<2x128xbf16>, vector<128x128xbf16>, vector<2x128xf32> -> vector<2x128xf32>
    %212 = vector.broadcast %8 : vector<1x128xf32> to vector<2x128xf32>
    %213 = arith.addf %211, %212 : vector<2x128xf32>
    %c0_46 = arith.constant 0 : index
    %c0_47 = arith.constant 0 : index
    %214 = vector.load %arg3[%c0_46, %c0_47] : memref<2x128xf32, #tpu.memory_space<vmem>>, vector<2x128xf32>
    tpu.vector_store %arg3[%c0_46, %c0_47], %213 {strides = array<i32>} : memref<2x128xf32, #tpu.memory_space<vmem>>, vector<2x128xf32>,
    return
  }
}

</mosaic_0001>

<bundles_post_ra>
// kernel: custom_cnn_forward.1
= control target key start
LH: loop header
LB: loop body
LE: loop exit
PB: predicated region body
PF: predicated region fallthrough
CT: control target
= control target key end

     0   :  { %v1629_v3 = vmov 0.0|0.0   ;;  %vm42_vm0 = vcmask 1045504   ;;  %v1630_v12 = vmov 0.0   ;;  %vm65_vm1 = vcmask 1041408   ;;  %s2086_s0 = inlined_call_operand.vmem [shape: f32[44,18], index: 0, kind: input, shape index: {}]   ;;  %s2087_s1 = inlined_call_operand.vmem [shape: f32[18,44], index: 1, kind: input, shape index: {}]   ;;  %s2088_s2 = inlined_call_operand.vmem [shape: bf16[704,128], index: 2, kind: input, shape index: {}]   ;;  %s2089_s3 = inlined_call_operand.hbm [shape: f32[2,128], index: 3, kind: output, shape index: {}]  }
   0x1   :  { %v1276_v0 = vld [vmem:[%s2088_s2 + $0x108] sm:$0xff]   ;;  %v1275_v1 = vld [vmem:[%s2088_s2 + $0xf8] sm:$0xff]   ;;  %v32_v2 = vld [vmem:[%s2088_s2 + $0x110] sm:$0x1]  ;;  %1473 = vmatprep.subr.bf16.mxu1 %v1629_v3  ;;  %1476 = vmatprep.subr.bf16.mxu0 %v1629_v3  ;;  %vm1631_vm2 = vmmov 0   ;;  %vm54_vm3 = vcmask 146432  }
   0x2   :  { %v35_v4 = vunpack.c.l.bf16 %v32_v2  ;;  %v26_v5 = vld [vmem:[%s2088_s2 + $0x100] sm:$0x1]  ;;  %v1682_v7 = vld [vmem:[%s2086_s0 + $0x8] sm:$0xff]  ;;  %1475 = vmatpush3.bf16.msra.mxu1 %v1276_v0  ;;  %1478 = vmatpush3.bf16.msra.mxu0 %v1275_v1  ;;  %v1689_v11 = vld [vmem:[%s2086_s0 + $0x10] sm:$0xff]  ;;  %vm268_vm4 = vcmask 1043456   ;;  %vm1632_vm5 = vmmov 1  }
   0x3   :  { %v1677_v6 = vld [vmem:[%s2086_s0] sm:$0xff]  ;;  %v29_v8 = vunpack.c.l.bf16 %v26_v5  ;;  %v44_v10 = vrot.slane %v1682_v7, 2  ;;  %1344 = vmatprep.subr.mxu1 %v1630_v12  ;;  %1365 = vmatprep.subr.mxu0 %v1630_v12  ;;  %v46_v13 = vrot.slane %v1689_v11, 2  ;;  %v1277_v15 = vld [vmem:[%s2088_s2 + $0x118] sm:$0xff]   ;;  %v1723_v20 = vld [vmem:[%s2086_s0 + $0x28] sm:$0xf] }
   0x4   :  { %v43_v9 = vrot.slane %v1677_v6, 2  ;;  %1346 = vmatprep.mubr.msk.f32.mxu1 %vm1631_vm2, %v1630_v12  ;;  %1367 = vmatprep.mubr.msk.f32.mxu0 %vm1631_vm2, %v1630_v12  ;;  %v1705_v16 = vld [vmem:[%s2086_s0 + $0x18] sm:$0xff]  ;;  %v264_v17 = vld [vmem:[%s2088_s2 + $0x120] sm:$0x1]  ;;  %v269_v22 = vrot.slane %v1677_v6, 4  ;;  %v270_v23 = vrot.slane %v1682_v7, 4  ;;  %vm1756_vm6 = vmpackc.low %vm268_vm4, %vm1632_vm5 }
   0x5   :  { %v1713_v18 = vld [vmem:[%s2086_s0 + $0x20] sm:$0xff]  ;;  %v47_v24 = vsel %vm42_vm0, %v44_v10, %v46_v13  ;;  %v48_v25 = vrot.slane %v1705_v16, 2  ;;  %v1740_v26 = vld [vmem:[%s2087_s1 + $0x8] sm:$0xff]  ;;  %v390_v27 = vld [vmem:[%s2087_s1 + $0x10] sm:$0x3]  ;;  %v267_v28 = vunpack.c.l.bf16 %v264_v17  ;;  %v52_v30 = vrot.slane %v1723_v20, 2 }
   0x6   :  { %v45_v14 = vsel %vm42_vm0, %v43_v9, %v44_v10  ;;  %1345 = vmatpush3.msk.msra.mxu1 %vm65_vm1, %v35_v4  ;;  %1366 = vmatpush3.msk.msra.mxu0 %vm65_vm1, %v29_v8  ;;  %v1280_v19 = vld [vmem:[%s2088_s2 + $0x140] sm:$0xff]   ;;  %v50_v29 = vrot.slane %v1713_v18, 2  ;;  %v272_v31 = vrot.slane %v1689_v11, 4  ;;  %v1281_v32 = vld [vmem:[%s2088_s2 + $0x148] sm:$0xff]   ;;  %v419_v35 = vrot.slane %v1740_v26, 2  ;;  %v1279_v46 = vld [vmem:[%s2088_s2 + $0x130] sm:$0xff]  }
   0x7   :  { %v1728_v21 = vld [vmem:[%s2087_s1] sm:$0xff]  ;;  %1347 = vmatmul.mubr.msk.f32.vlgmr.msra.gmra.mrb[0].mxu1 %vm54_vm3, %v45_v14  ;;  %1368 = vmatmul.mubr.msk.f32.vlgmr.msra.gmra.mrb[0].mxu0 %vm54_vm3, %v1677_v6  ;;  %v421_v36 = vrot.slane %v390_v27, 2  ;;  %v274_v37 = vrot.slane %v1705_v16, 4  ;;  %v49_v38 = vsel %vm42_vm0, %v46_v13, %v48_v25  ;;  %v1569_v39 = vld [vmem:[%s2088_s2 + $0x150] sm:$0x3f]   ;;  %vm423_vm7 = vcmask 359424  }
   0x8   :  { %1479 = vmatprep.subr.bf16.mxu0 %v1629_v3  ;;  %1349 = vmatprep.mubr.msk.f32.mxu1 %vm1631_vm2, %v1630_v12  ;;  %v418_v34 = vrot.slane %v1728_v21, 2  ;;  %v51_v40 = vsel %vm42_vm0, %v48_v25, %v50_v29  ;;  %v1278_v41 = vld [vmem:[%s2088_s2 + $0x128] sm:$0xff]   ;;  %v53_v42 = vsel %vm42_vm0, %v50_v29, %v52_v30  ;;  %v271_v44 = vsel %vm268_vm4, %v269_v22, %v270_v23  ;;  %v1570_v47 = vld [vmem:[%s2088_s2 + $0x138] sm:$0x3f]  }
   0x9   :  { %1481 = vmatpush3.bf16.msra.mxu0 %v1277_v15  ;;  %1370 = vmatprep.mubr.msk.f32.mxu0 %vm1631_vm2, %v1630_v12  ;;  %v422_v45 = vsel %vm42_vm0, %v419_v35, %v421_v36  ;;  %v273_v48 = vsel %vm268_vm4, %v270_v23, %v272_v31 }
   0xa   :  { %1483 = vmatprep.subr.bf16.mxu1 %v1280_v19  ;;  %1386 = vmatprep.subr.mxu0 %v1630_v12  ;;  %v420_v43 = vsel %vm42_vm0, %v418_v34, %v419_v35 }
   0xb   :  { %1350 = vmatmul.mubr.msk.f32.gmra.mrb[2].mxu1 %vm54_vm3, %v47_v24  ;;  %1371 = vmatmul.mubr.msk.f32.gmra.mrb[2].mxu0 %vm54_vm3, %v1682_v7 }
   0xc   :  { %1352 = vmatprep.mubr.msk.f32.mxu1 %vm1631_vm2, %v1630_v12  ;;  %1373 = vmatprep.mubr.msk.f32.mxu0 %vm1631_vm2, %v1630_v12 }
   0xd   :  { %1485 = vmatpush3.bf16.msra.mxu1 %v1280_v19  ;;  %1387 = vmatpush3.msk.msra.mxu0 %vm65_vm1, %v267_v28 }
   0xe   :  { %1487 = vmatprep.subr.bf16.mxu1 %v1281_v32  ;;  %1433 = vmatprep.subr.bf16.mxu0 %v1630_v12 }
   0xf   :  { %1353 = vmatmul.mubr.msk.f32.gmra.mrb[4].mxu1 %vm54_vm3, %v49_v38  ;;  %1374 = vmatmul.mubr.msk.f32.gmra.mrb[4].mxu0 %vm54_vm3, %v1689_v11 }
  0x10   :  { %1355 = vmatprep.mubr.msk.f32.mxu1 %vm1631_vm2, %v1630_v12  ;;  %1376 = vmatprep.mubr.msk.f32.mxu0 %vm1631_vm2, %v1630_v12 }
  0x11   :  { %1489 = vmatpush3.bf16.msra.mxu1 %v1281_v32 }
  0x12   :  { %1492 = vmatprep.subr.msk.bf16.mxu1 %vm1756_vm6, %v1569_v39 }
  0x13   :  { %1356 = vmatmul.mubr.msk.f32.gmra.mrb[6].mxu1 %vm54_vm3, %v51_v40  ;;  %1377 = vmatmul.mubr.msk.f32.gmra.mrb[6].mxu0 %vm54_vm3, %v1705_v16 }
  0x14   :  { %1358 = vmatprep.mubr.msk.f32.mxu1 %vm1631_vm2, %v1630_v12  ;;  %1379 = vmatprep.mubr.msk.f32.mxu0 %vm1631_vm2, %v1630_v12 }
  0x15   :  { %1495 = vmatpush3.bf16.msk.msra.mxu1 %vm1756_vm6, %v1569_v39 }
  0x16   :  { %1497 = vmatprep.subr.bf16.mxu1 %v1278_v41 }
  0x17   :  { %1359 = vmatmul.mubr.msk.f32.gmra.mrb[8].mxu1 %vm54_vm3, %v53_v42  ;;  %1380 = vmatmul.mubr.msk.f32.gmra.mrb[8].mxu0 %vm54_vm3, %v1713_v18 }
  0x18   :  { %1388 = vmatprep.mubr.msk.f32.mxu0 %vm1631_vm2, %v1630_v12  ;;  %1415 = vmatprep.mubr.msk.f32.mxu1 %vm423_vm7, %v420_v43 }
  0x1b   :  { %1389 = vmatmul.mubr.msk.f32.vlgmr.msra.gmra.mrb[0].mxu0 %vm54_vm3, %v271_v44  ;;  %1416 = vmatmul.mubr.msk.f32.vlgmr.msra.gmra.mrb[10].mxu1 %vm423_vm7, %v422_v45 }
  0x1c   :  { %1499 = vmatpush3.bf16.msra.mxu1 %v1278_v41  ;;  %1391 = vmatprep.mubr.msk.f32.mxu0 %vm1631_vm2, %v1630_v12 }
  0x1d   :  { %1501 = vmatprep.subr.bf16.mxu1 %v1279_v46  ;;  %1430 = vmatprep.mubr.msk.f32.mxu1 %vm423_vm7, %v1728_v21 }
  0x1e   :  { %8 = vsyncpa [#allocation3], 0  ;;  %v275_v49 = vsel %vm268_vm4, %v272_v31, %v274_v37  ;;  %v276_v50 = vrot.slane %v1713_v18, 4  ;;  %v278_v52 = vrot.slane %v1723_v20, 4  ;;  %v1571_v54 = vld [vmem:[%s2088_s2] sm:$0xff]   ;;  %v1633_v55 = vmov 0  }
  0x1f   :  { %1392 = vmatmul.mubr.msk.f32.gmra.mrb[2].mxu0 %vm54_vm3, %v273_v48  ;;  %v1572_v56 = vld [vmem:[%s2088_s2 + $0x8] sm:$0xff]   ;;  %v1573_v57 = vld [vmem:[%s2088_s2 + $0x10] sm:$0xff]   ;;  %v1574_v58 = vld [vmem:[%s2088_s2 + $0x18] sm:$0xff]   ;;  %vm588_vm8 = vcmask 130048   ;;  %s1634_s24 = smov 64   ;;  %s1635_s25 = smov 32  }
  0x20   :  { %1503 = vmatpush3.bf16.msra.mxu1 %v1279_v46  ;;  %1394 = vmatprep.mubr.msk.f32.mxu0 %vm1631_vm2, %v1630_v12  ;;  %v277_v51 = vsel %vm268_vm4, %v274_v37, %v276_v50  ;;  %v279_v53 = vsel %vm268_vm4, %v276_v50, %v278_v52  ;;  %v1575_v59 = vld [vmem:[%s2088_s2 + $0x20] sm:$0xff]   ;;  %v1576_v60 = vld [vmem:[%s2088_s2 + $0x28] sm:$0xff]   ;;  %v1577_v61 = vld [vmem:[%s2088_s2 + $0x30] sm:$0xff]   ;;  %s1636_s30 = smov 48   ;;  %s1637_s4 = smov 16   ;;  %vm779_vm9 = vcmask 261120  }
  0x21   :  { %1506 = vmatprep.subr.msk.bf16.mxu1 %vm1756_vm6, %v1570_v47  ;;  %v1578_v62 = vld [vmem:[%s2088_s2 + $0x38] sm:$0xff]   ;;  %v1579_v1 = vld [vmem:[%s2088_s2 + $0x40] sm:$0xff]   ;;  %v1580_v4 = vld [vmem:[%s2088_s2 + $0x48] sm:$0xff]   ;;  %s1638_s7 = smov 96   ;;  %s1639_s8 = smov 80   ;;  %vm781_vm10 = vcmask 392192  }
  0x22   :  { %s1640_s11 = smov 112   ;;  %vm783_vm11 = vcmask 523264   ;;  %vm785_vm12 = vcmask 654336   ;;  %vm787_vm13 = vcmask 785408   ;;  %vm789_vm14 = vcmask 916480   ;;  %s1641_s9 = smov [#allocation2]  }
  0x23   :  { %1395 = vmatmul.mubr.msk.f32.gmra.mrb[4].mxu0 %vm54_vm3, %v275_v49  ;;  %s1184_s10 = sshll.u32 %s1641_s9, 4  ;;  %s1185_s10 = int_to_ptr.vmem [resolvable:$true] %s1184_s10 }
  0x24   :  { %1509 = vmatpush3.bf16.msk.msra.mxu1 %vm1756_vm6, %v1570_v47  ;;  %1397 = vmatprep.mubr.msk.f32.mxu0 %vm1631_vm2, %v1630_v12  ;;  %p1610_p1 = scmp.lt.s32.totalorder %s1185_s10, %s1185_s10 }
  0x25   :  { %949 = vmatprep.subr.bf16.mxu1 %v1633_v55 }
  0x27   :  { %1431 = vmatmul.mubr.msk.f32.vlgmr.msra.gmra.mrb[10].mxu1 %vm423_vm7, %v1740_v26  ;;  %1398 = vmatmul.mubr.msk.f32.gmra.mrb[6].mxu0 %vm54_vm3, %v277_v51 }
  0x28   :  { %1400 = vmatprep.mubr.msk.f32.mxu0 %vm1631_vm2, %v1630_v12  ;;  %950 = vmatpush1.bf16.msra.mxu1 %v1571_v54 }
  0x29   :  { %951 = vmatprep.subr.bf16.mxu1 %v1633_v55 }
  0x2b   :  { %1401 = vmatmul.mubr.msk.f32.gmra.mrb[8].mxu0 %vm54_vm3, %v279_v53 }
  0x2c   :  { %1449 = vmatprep.mubr.msk.bf16.mxu0 %vm1631_vm2, %v1630_v12  ;;  %952 = vmatpush1.bf16.msra.mxu1 %v1572_v56 }
  0x2d   :  { %953 = vmatprep.subr.bf16.mxu1 %v1633_v55 }
  0x30   :  { %954 = vmatpush1.bf16.msra.mxu1 %v1573_v57 }
  0x31   :  { %955 = vmatprep.subr.bf16.mxu1 %v1633_v55 }
  0x34   :  { %956 = vmatpush1.bf16.msra.mxu1 %v1574_v58 }
  0x35   :  { %957 = vmatprep.subr.bf16.mxu1 %v1633_v55 }
  0x38   :  { %958 = vmatpush1.bf16.msra.mxu1 %v1575_v59 }
  0x39   :  { %959 = vmatprep.subr.bf16.mxu1 %v1633_v55 }
  0x3c   :  { %960 = vmatpush1.bf16.msra.mxu1 %v1576_v60 }
  0x3d   :  { %961 = vmatprep.subr.bf16.mxu1 %v1633_v55 }
  0x40   :  { %962 = vmatpush1.bf16.msra.mxu1 %v1577_v61 }
  0x41   :  { %963 = vmatprep.subr.bf16.mxu1 %v1633_v55 }
  0x44   :  { %964 = vmatpush1.bf16.msra.mxu1 %v1578_v62 }
  0x45   :  { %965 = vmatprep.subr.bf16.mxu1 %v1633_v55 }
  0x48   :  { %966 = vmatpush1.bf16.msra.mxu1 %v1579_v1 }
  0x49   :  { %967 = vmatprep.subr.bf16.mxu1 %v1633_v55 }
  0x4c   :  { %968 = vmatpush1.bf16.msra.mxu1 %v1580_v4 }
  0x4d   :  { %969 = vmatprep.subr.bf16.mxu1 %v1633_v55 }
  0xda   :  { %v135_v63 = vpop.f32.mrb[0].mxu1 }
  0xdb   :  { %v1348_v0 = vpop.f32.mrb[1].mxu1 }
  0xde   :  { %v140_v2 = vpop.f32.mrb[2].mxu1 }
  0xdf   :  { %v1351_v3 = vpop.f32.mrb[3].mxu1 }
  0xe2   :  { %v145_v5 = vpop.f32.mrb[4].mxu1 }
  0xe3   :  { %v1354_v6 = vpop.f32.mrb[5].mxu1 }
  0xe6   :  { %v150_v7 = vpop.f32.mrb[6].mxu1 }
  0xe7   :  { %v1357_v8 = vpop.f32.mrb[7].mxu1 }
  0xea   :  { %v155_v9 = vpop.f32.mrb[8].mxu1 }
  0xeb   :  { %v1360_v10 = vpop.f32.mrb[9].mxu1 }
  0xee   :  { %v359_v11 = vpop.f32.mrb[0].mxu0 }
  0xef   :  { %v1890_v13 = vadd.f32 %v359_v11, %v135_v63  ;;  %v1390_v14 = vpop.f32.mrb[1].mxu0 }
  0xf1   :  { %v605_v16 = vmul.f32 %v1890_v13, %v1890_v13  ;;  %v589_v19 = vsel %vm588_vm8, %v1890_v13, 0.0 }
  0xf2   :  { %v364_v15 = vpop.f32.mrb[2].mxu0 }
  0xf3   :  { %v1894_v17 = vadd.f32 %v364_v15, %v140_v2  ;;  %v1393_v18 = vpop.f32.mrb[3].mxu0  ;;  %v610_v24 = vsel %vm588_vm8, %v605_v16, 0.0 }
  0xf5   :  { %v590_v20 = vsel %vm588_vm8, %v1894_v17, 0.0  ;;  %v606_v21 = vmul.f32 %v1894_v17, %v1894_v17 }
  0xf6   :  { %v591_v22 = vadd.f32 %v590_v20, %v589_v19  ;;  %v369_v23 = vpop.f32.mrb[4].mxu0 }
  0xf7   :  { %v611_v25 = vsel %vm588_vm8, %v606_v21, 0.0  ;;  %v1904_v26 = vadd.f32 %v369_v23, %v145_v5  ;;  %v1396_v27 = vpop.f32.mrb[5].mxu0 }
  0xf8   :  { %v612_v28 = vadd.f32 %v611_v25, %v610_v24 }
  0xf9   :  { %v592_v29 = vsel %vm588_vm8, %v1904_v26, 0.0  ;;  %v607_v30 = vmul.f32 %v1904_v26, %v1904_v26 }
  0xfa   :  { %v593_v31 = vadd.f32 %v592_v29, %v591_v22  ;;  %v1910_v32 = vpop.f32.mrb[10].mxu1  ;;  %v374_v33 = vpop.f32.mrb[6].mxu0 }
  0xfb   :  { %v613_v34 = vsel %vm588_vm8, %v607_v30, 0.0  ;;  %v637_v35 = vsel %vm588_vm8, %v1910_v32, 0.0  ;;  %v647_v36 = vmul.f32 %v1910_v32, %v1910_v32  ;;  %v1917_v37 = vpop.f32.mrb[11].mxu1  ;;  %v1399_v38 = vpop.f32.mrb[7].mxu0  ;;  %v1919_v40 = vadd.f32 %v374_v33, %v150_v7 }
  0xfc   :  { %v614_v39 = vadd.f32 %v613_v34, %v612_v28  ;;  %v636_v41 = vsel %vm588_vm8, %v1917_v37, 0.0  ;;  %v646_v42 = vmul.f32 %v1917_v37, %v1917_v37 }
  0xfd   :  { %v649_v43 = vsel %vm588_vm8, %v647_v36, 0.0  ;;  %v638_v44 = vadd.f32 %v637_v35, %v636_v41  ;;  %v594_v45 = vsel %vm588_vm8, %v1919_v40, 0.0  ;;  %v608_v46 = vmul.f32 %v1919_v40, %v1919_v40  ;;  %v16_v36 = vld [vmem:[%s2088_s2 + $0xf0] sm:$0xf] }
  0xfe   :  { %v648_v47 = vsel %vm588_vm8, %v646_v42, 0.0  ;;  %v379_v48 = vpop.f32.mrb[8].mxu0  ;;  %v595_v49 = vadd.f32 %v594_v45, %v593_v31  ;;  %v673_v35 = vlaneseq }
  0xff   :  { %v639_v50 = vrot.slane %v638_v44, 4  ;;  %v650_v51 = vadd.f32 %v649_v43, %v648_v47  ;;  %v1402_v52 = vpop.f32.mrb[9].mxu0  ;;  %v615_v53 = vsel %vm588_vm8, %v608_v46, 0.0  ;;  %v1932_v54 = vadd.f32 %v379_v48, %v155_v9 }
 0x100   :  { %v616_v56 = vadd.f32 %v615_v53, %v614_v39  ;;  %v1942_v39 = vunpack.c.l.bf16 %v16_v36  ;;  %v1944_v41 = vshrl.u32 %v673_v35, 7  ;;  %v723_v43 = vrot.slane %v1910_v32, 2 }
 0x101   :  { %v640_v57 = vadd.f32 %v639_v50, %v638_v44  ;;  %v651_v58 = vrot.slane %v650_v51, 4  ;;  %v596_v59 = vsel %vm588_vm8, %v1932_v54, 0.0  ;;  %v609_v60 = vmul.f32 %v1932_v54, %v1932_v54 }
 0x102   :  { %v597_v63 = vadd.f32 %v596_v59, %v595_v49  ;;  %v708_v44 = vrot.slane %v1917_v37, 2  ;;  %v714_v46 = vsub.s32 2, %v1944_v41  ;;  %v719_v49 = vsub.s32 3, %v1944_v41 }
 0x103   :  { %v641_v61 = vrot.slane %v640_v57, 2  ;;  %v652_v62 = vadd.f32 %v651_v58, %v650_v51  ;;  %v617_v0 = vsel %vm588_vm8, %v609_v60, 0.0  ;;  %v725_v50 = vadd.f32 %v1910_v32, %v723_v43  ;;  %v1584_v43 = vld [vmem:[%s2088_s2 + $0x68] sm:$0xff]  }
 0x104   :  { %v598_v3 = vrot.slane %v597_v63, 4  ;;  %v618_v4 = vadd.f32 %v617_v0, %v616_v56  ;;  %v710_v51 = vadd.f32 %v708_v44, %v1917_v37  ;;  %v690_v58 = vrot.slane %v1904_v26, 2 }
 0x105   :  { %v642_v1 = vadd.f32 %v641_v61, %v640_v57  ;;  %v653_v2 = vrot.slane %v652_v62, 2  ;;  %v684_v57 = vrot.slane %v1894_v17, 2  ;;  %v675_v59 = vsub.s32 0, %v1944_v41 }
 0x106   :  { %v599_v7 = vadd.f32 %v598_v3, %v597_v63  ;;  %v619_v8 = vrot.slane %v618_v4, 4  ;;  %v669_v0 = vrot.slane %v1890_v13, 2  ;;  %v696_v32 = vrot.slane %v1919_v40, 2 }
 0x107   :  { %v643_v5 = vrot.slane %v642_v1, 1  ;;  %v654_v6 = vadd.f32 %v653_v2, %v652_v62  ;;  %v702_v37 = vrot.slane %v1932_v54, 2 }
 0x108   :  { %v600_v10 = vrot.slane %v599_v7, 2  ;;  %v620_v11 = vadd.f32 %v619_v8, %v618_v4 }
 0x109   :  { %v655_v9 = vrot.slane %v654_v6, 1  ;;  %v644_v14 = vadd.f32 %v643_v5, %v642_v1  ;;  %v1581_v1 = vld [vmem:[%s2088_s2 + $0x50] sm:$0xff]   ;;  %v680_v5 = vsub.s32 1, %v1944_v41 }
 0x10a   :  { %v601_v16 = vadd.f32 %v600_v10, %v599_v7  ;;  %v621_v18 = vrot.slane %v620_v11, 2  ;;  %v686_v7 = vadd.f32 %v1894_v17, %v684_v57  ;;  %970 = vmatpush1.bf16.msra.mxu1 %v1581_v1 }
 0x10b   :  { %v656_v15 = vadd.f32 %v655_v9, %v654_v6  ;;  %v645_v19 = vmul.f32 0.0625, %v644_v14  ;;  %v692_v6 = vadd.f32 %v1904_v26, %v690_v58  ;;  %971 = vmatprep.subr.bf16.mxu1 %v1633_v55  ;;  %v671_v14 = vadd.f32 %v1890_v13, %v669_v0 }
 0x10c   :  { %v602_v21 = vrot.slane %v601_v16, 1  ;;  %v622_v22 = vadd.f32 %v621_v18, %v620_v11 }
 0x10d   :  { %v657_v20 = vmul.f32 0.0625, %v656_v15  ;;  %v658_v23 = vmul.f32 %v645_v19, %v645_v19  ;;  %v704_v15 = vadd.f32 %v1932_v54, %v702_v37 }
 0x10e   :  { %v603_v24 = vadd.f32 %v602_v21, %v601_v16  ;;  %v623_v25 = vrot.slane %v622_v22, 1  ;;  %v698_v16 = vadd.f32 %v1919_v40, %v696_v32 }
 0x10f   :  { %v659_v27 = vsub.f32 %v657_v20, %v658_v23 }
 0x110   :  { %v604_v28 = vmul.f32 0.025, %v603_v24  ;;  %v624_v29 = vadd.f32 %v623_v25, %v622_v22  ;;  %v1582_v22 = vld [vmem:[%s2088_s2 + $0x58] sm:$0xff]  }
 0x111   :  { %v660_v30 = vadd.f32 1e-05, %v659_v27  ;;  %972 = vmatpush1.bf16.msra.mxu1 %v1582_v22 }
 0x112   :  { %v625_v31 = vmul.f32 0.025, %v624_v29  ;;  %v626_v33 = vmul.f32 %v604_v28, %v604_v28  ;;  %973 = vmatprep.subr.bf16.mxu1 %v1633_v55  ;;  %v1583_v29 = vld [vmem:[%s2088_s2 + $0x60] sm:$0xff]  }
 0x113   :  { %1601 = vrsqrt.f32 %v660_v30 }
 0x114   :  { %v627_v34 = vsub.f32 %v625_v31, %v626_v33 }
 0x115   :  { %974 = vmatpush1.bf16.msra.mxu1 %v1583_v29  ;;  %v1594_v29 = vld [vmem:[%s2088_s2 + $0xb8] sm:$0xff]  }
 0x116   :  { %v628_v38 = vadd.f32 1e-05, %v627_v34  ;;  %975 = vmatprep.subr.bf16.mxu1 %v1633_v55  ;;  %v1587_v55 = vld [vmem:[%s2088_s2 + $0x80] sm:$0xff]  }
 0x118   :  { %1603 = vrsqrt.f32 %v628_v38 }
 0x119   :  { %976 = vmatpush1.bf16.msra.mxu1 %v1584_v43 }
 0x11d   :  { %v1602_v42 = vpop.eup %1601 }
 0x11e   :  { %v662_v45 = vmul.f32 %v1602_v42, %v1942_v39 }
 0x120   :  { %v663_v47 = vmul.f32 %v662_v45, %v645_v19  ;;  %v711_v48 = vmul.f32 0.5, %v662_v45  ;;  %v1585_v45 = vld [vmem:[%s2088_s2 + $0x70] sm:$0xff]  }
 0x121   :  { %1434 = vmatpush3.bf16.msra.mxu0 %v1585_v45 }
 0x122   :  { %v665_v52 = vrot.slane %v663_v47, 7  ;;  %v715_v53 = vrot.slane %v711_v48, %v714_v46  ;;  %v1604_v56 = vpop.eup %1603  ;;  %v1586_v46 = vld [vmem:[%s2088_s2 + $0x78] sm:$0xff]   ;;  %1435 = vmatprep.subr.bf16.mxu0 %v1630_v12  ;;  %v1588_v48 = vld [vmem:[%s2088_s2 + $0x88] sm:$0xff]  }
 0x123   :  { %v630_v60 = vmul.f32 %v1604_v56, %v1942_v39 }
 0x124   :  { %v667_v61 = vsub.f32 %v1942_v39, %v665_v52  ;;  %v726_v62 = vmul.f32 %v725_v50, %v715_v53  ;;  %v716_v63 = vmul.f32 %v715_v53, %v710_v51  ;;  %v1590_v50 = vld [vmem:[%s2088_s2 + $0x98] sm:$0xff]  }
 0x125   :  { %v631_v2 = vmul.f32 %v630_v60, %v604_v28  ;;  %v672_v3 = vmul.f32 0.5, %v630_v60  ;;  %1436 = vmatpush3.bf16.msra.mxu0 %v1586_v46 }
 0x126   :  { %v720_v4 = vrot.slane %v667_v61, %v719_v49  ;;  %1437 = vmatprep.subr.bf16.mxu0 %v1630_v12  ;;  %v1589_v49 = vld [vmem:[%s2088_s2 + $0x90] sm:$0xff]  }
 0x127   :  { %v633_v8 = vrot.slane %v631_v2, 7  ;;  %v676_v9 = vrot.slane %v672_v3, %v675_v59 }
 0x128   :  { %v727_v10 = vadd.f32 %v726_v62, %v720_v4  ;;  %v721_v11 = vadd.f32 %v720_v4, %v716_v63 }
 0x129   :  { %v635_v18 = vsub.f32 %v1942_v39, %v633_v8  ;;  %v693_v19 = vmul.f32 %v692_v6, %v676_v9  ;;  %v687_v20 = vmul.f32 %v686_v7, %v676_v9  ;;  %v677_v26 = vmul.f32 %v676_v9, %v671_v14  ;;  %1438 = vmatpush3.bf16.msra.mxu0 %v1587_v55 }
 0x12a   :  { %v705_v21 = vmul.f32 %v704_v15, %v676_v9  ;;  %v699_v17 = vmul.f32 %v698_v16, %v676_v9  ;;  %v774_v40 = vrot.slane %v727_v10, 4  ;;  %v766_v27 = vrot.slane %v721_v11, 4  ;;  %1439 = vmatprep.subr.bf16.mxu0 %v1630_v12 }
 0x12b   :  { %v681_v23 = vrot.slane %v635_v18, %v680_v5 }
 0x12d   :  { %v694_v24 = vadd.f32 %v693_v19, %v681_v23  ;;  %v688_v25 = vadd.f32 %v687_v20, %v681_v23  ;;  %v1975_v13 = vadd.f32 %v681_v23, %v677_v26  ;;  %v1977_v54 = vadd.f32 %v705_v21, %v681_v23  ;;  %1440 = vmatpush3.bf16.msra.mxu0 %v1588_v48  ;;  %v1591_v26 = vld [vmem:[%s2088_s2 + $0xa0] sm:$0xff]   ;;  %v1592_v21 = vld [vmem:[%s2088_s2 + $0xa8] sm:$0xff]  }
 0x12e   :  { %v700_v28 = vadd.f32 %v699_v17, %v681_v23  ;;  %1441 = vmatprep.subr.bf16.mxu0 %v1630_v12  ;;  %v860_v17 = vsub.s32 4, %v1944_v41 }
 0x12f   :  { %v1549_v30 = vpack.i.bf16 %v727_v10, %v694_v24  ;;  %v745_v31 = vrot.slane %v694_v24, 4  ;;  %v1544_v33 = vpack.i.bf16 %v721_v11, %v688_v25  ;;  %v737_v34 = vrot.slane %v688_v25, 4 }
 0x130   :  { %v729_v35 = vrot.slane %v1975_v13, 4  ;;  %v758_v36 = vrot.slane %v1977_v54, 4  ;;  %v753_v47 = vrot.slane %v700_v28, 4  ;;  %v861_v22 = vrot.slane %v1942_v39, %v860_v17 }
 0x131   :  { %1550 = vrot.lane.b32.xlu1 %v1549_v30, %s1634_s24  ;;  %1545 = vrot.lane.b32.xlu0 %v1544_v33, %s1635_s25  ;;  %v1559_v38 = vpack.i.bf16 %v766_v27, %v737_v34  ;;  %v1564_v42 = vpack.i.bf16 %v774_v40, %v745_v31  ;;  %v1593_v27 = vld [vmem:[%s2088_s2 + $0xb0] sm:$0xff]   ;;  %v1595_v30 = vld [vmem:[%s2088_s2 + $0xc0] sm:$0xff]  }
 0x132   :  { %v1554_v44 = vpack.i.bf16 %v758_v36, %v729_v35  ;;  %1442 = vmatpush3.bf16.msra.mxu0 %v1589_v49  ;;  %v1596_v31 = vld [vmem:[%s2088_s2 + $0xc8] sm:$0xff]   ;;  %v1597_v33 = vld [vmem:[%s2088_s2 + $0xd0] sm:$0xff]   ;;  %v1598_v34 = vld [vmem:[%s2088_s2 + $0xd8] sm:$0xff]   ;;  %v1087_v49 = vsub.s32 6, %v1944_v41 }
 0x133   :  { %1443 = vmatprep.subr.bf16.mxu0 %v1630_v12  ;;  %v1599_v35 = vld [vmem:[%s2088_s2 + $0xe0] sm:$0xff]   ;;  %v1600_v36 = vld [vmem:[%s2088_s2 + $0xe8] sm:$0xff]   ;;  %s1605_s2 = scalar_lea.vmem %s1185_s10, 32 }
 0x134   :  { %p1606_p0 = scmp.ne.s32.totalorder %s1185_s10, %s1605_s2  ;;  %p1611_p2 = scmp.lt.s32.totalorder %s1605_s2, %s1605_s2 }
 0x135   :  { %1560 = vrot.lane.b32.xlu1 %v1559_v38, %s1636_s30  ;;  %1555 = vrot.lane.b32.xlu0 %v1554_v44, %s1637_s4  ;;  %v993_v38 = vsub.s32 5, %v1944_v41 }
 0x136   :  { %1444 = vmatpush3.bf16.msra.mxu0 %v1590_v50  ;;  %p1612_p3 = por %p1611_p2, %p1610_p1 }
 0x137   :  { %1445 = vmatprep.subr.bf16.mxu0 %v1630_v12 }
 0x138   :  { %p1613_p4 = pnand %p1612_p3, %p1606_p0 }
 0x139   :  { %750 = vrot.lane.b32.xlu1 %v700_v28, %s1638_s7  ;;  %1565 = vrot.lane.b32.xlu0 %v1564_v42, %s1639_s8  ;;  %v994_v42 = vrot.slane %v1942_v39, %v993_v38 }
 0x13a   :  { %1446 = vmatpush3.bf16.msra.mxu0 %v1591_v26 }
 0x13b   :  { %1447 = vmatprep.subr.bf16.mxu0 %v1630_v12 }
 0x13d   :  { %754 = vrot.lane.b32.xlu0 %v753_v47, %s1640_s11 }
 0x13e   :  { %1448 = vmatpush3.bf16.msra.mxu0 %v1592_v21 }
 0x13f   :  { %1453 = vmatprep.subr.bf16.mxu0 %v1630_v12 }
 0x1a3   :  { %v1551_v51 = vpop.permute.xlu1 %1550  ;;  %v1546_v52 = vpop.permute.xlu0 %1545 }
 0x1a4   :  { %v1548_v59 = vunpack.i.h.bf16 %v1546_v52  ;;  %v1547_v60 = vunpack.i.l.bf16 %v1546_v52  ;;  %v1553_v32 = vunpack.i.h.bf16 %v1551_v51  ;;  %v1552_v37 = vunpack.i.l.bf16 %v1551_v51 }
 0x1a7   :  { %v1561_v53 = vpop.permute.xlu1 %1560  ;;  %v1556_v56 = vpop.permute.xlu0 %1555 }
 0x1a8   :  { %v1558_v57 = vunpack.i.h.bf16 %v1556_v56  ;;  %v1557_v58 = vunpack.i.l.bf16 %v1556_v56  ;;  %v1563_v61 = vunpack.i.h.bf16 %v1561_v53  ;;  %v1562_v62 = vunpack.i.l.bf16 %v1561_v53 }
 0x1aa   :  { %v791_v63 = vsel %vm588_vm8, %v1977_v54, %v1558_v57  ;;  %v778_v0 = vsel %vm588_vm8, %v1975_v13, %v1557_v58 }
 0x1ab   :  { %v792_v1 = vsel %vm779_vm9, %v791_v63, %v1548_v59  ;;  %v780_v2 = vsel %vm779_vm9, %v778_v0, %v1547_v60  ;;  %v1566_v3 = vpop.permute.xlu0 %1565  ;;  %v751_v10 = vpop.permute.xlu1 %750 }
 0x1ac   :  { %v1568_v4 = vunpack.i.h.bf16 %v1566_v3  ;;  %v1567_v5 = vunpack.i.l.bf16 %v1566_v3  ;;  %v793_v6 = vsel %vm781_vm10, %v792_v1, %v1563_v61  ;;  %v782_v7 = vsel %vm781_vm10, %v780_v2, %v1562_v62 }
 0x1ad   :  { %v794_v8 = vsel %vm783_vm11, %v793_v6, %v1553_v32  ;;  %v784_v9 = vsel %vm783_vm11, %v782_v7, %v1552_v37 }
 0x1ae   :  { %v795_v11 = vsel %vm785_vm12, %v794_v8, %v1568_v4  ;;  %v786_v14 = vsel %vm785_vm12, %v784_v9, %v1567_v5 }
 0x1af   :  { %v857_v15 = vpack.c.bf16 %v795_v11, %v795_v11  ;;  %v755_v16 = vpop.permute.xlu0 %754  ;;  %v788_v18 = vsel %vm787_vm13, %v786_v14, %v751_v10 }
 0x1b0   :  { %v790_v19 = vsel %vm789_vm14, %v788_v18, %v755_v16 }
 0x1b1   :  { %v856_v20 = vpack.c.bf16 %v790_v19, %v790_v19  ;;  %1230 = vmatprep.mubr.msk.bf16.mxu1 %vm787_vm13, %v857_v15 }
 0x1b3   :  { %982 = vmatmul.mubr.bf16.vlgmr.msra.gmra.mrb[12].mxu1 %v856_v20 }
 0x286   :  { %v983_v23 = vpop.f32.mrb[12].mxu1 }
 0x287   :  { %v984_v24 = vadd.f32 %v983_v23, %v861_v22  ;;  %v985_v25 = vpop.f32.mrb[13].mxu1 }
 0x288   :  { %v986_v13 = vpop.f32.mrb[14].mxu1 }
 0x289   :  { %v989_v54 = vmax.f32 %v984_v24, 0.0  ;;  %v987_v40 = vpop.f32.mrb[15].mxu1 }
 0x28b   :  { %v990_v28 = vpack.c.bf16 %v989_v54, %v989_v54 }
 0x28d   :  { %1450 = vmatmul.mubr.bf16.vlgmr.msra.gmra.mrb[12].mxu0 %v990_v28 }
 0x28e   :  { %1454 = vmatpush3.bf16.msra.mxu0 %v1593_v27  ;;  %1469 = vmatprep.mubr.msk.bf16.mxu0 %vm1631_vm2, %v1630_v12 }
 0x28f   :  { %1455 = vmatprep.subr.bf16.mxu0 %v1630_v12 }
 0x292   :  { %1456 = vmatpush3.bf16.msra.mxu0 %v1594_v29 }
 0x293   :  { %1457 = vmatprep.subr.bf16.mxu0 %v1630_v12 }
 0x296   :  { %1458 = vmatpush3.bf16.msra.mxu0 %v1595_v30 }
 0x297   :  { %1459 = vmatprep.subr.bf16.mxu0 %v1630_v12 }
 0x29a   :  { %1460 = vmatpush3.bf16.msra.mxu0 %v1596_v31 }
 0x29b   :  { %1461 = vmatprep.subr.bf16.mxu0 %v1630_v12 }
 0x29e   :  { %1462 = vmatpush3.bf16.msra.mxu0 %v1597_v33 }
 0x29f   :  { %1463 = vmatprep.subr.bf16.mxu0 %v1630_v12 }
 0x2a2   :  { %1464 = vmatpush3.bf16.msra.mxu0 %v1598_v34 }
 0x2a3   :  { %1465 = vmatprep.subr.bf16.mxu0 %v1630_v12 }
 0x2a6   :  { %1466 = vmatpush3.bf16.msra.mxu0 %v1599_v35 }
 0x2a7   :  { %1467 = vmatprep.subr.bf16.mxu0 %v1630_v12  ;;  %v1088_v12 = vrot.slane %v1942_v39, %v1087_v49 }
 0x2aa   :  { %1468 = vmatpush3.bf16.msra.mxu0 %v1600_v36 }
 0x360   :  { %v1077_v43 = vpop.f32.mrb[12].mxu0 }
 0x361   :  { %v1078_v44 = vadd.f32 %v1077_v43, %v994_v42  ;;  %v1451_v45 = vpop.f32.mrb[13].mxu0 }
 0x362   :  { %v1080_v46 = vpop.f32.mrb[14].mxu0 }
 0x363   :  { %v1083_v55 = vmax.f32 %v1078_v44, 0.0  ;;  %v1452_v47 = vpop.f32.mrb[15].mxu0 }
 0x365   :  { %v1084_v48 = vpack.c.bf16 %v1083_v55, %v1083_v55 }
 0x367   :  { %1470 = vmatmul.mubr.bf16.vlgmr.msra.gmra.mrb[16].mxu0 %v1084_v48 }
 0x43a   :  { %v1171_v50 = vpop.f32.mrb[16].mxu0 }
 0x43b   :  { %v1172_v51 = vadd.f32 %v1171_v50, %v1088_v12  ;;  %v1471_v52 = vpop.f32.mrb[17].mxu0 }
 0x43c   :  { %v1174_v53 = vpop.f32.mrb[18].mxu0 }
 0x43d   :  { %1177 = vst [vmem:[#allocation2] sm:$0x3] %v1172_v51  ;;  %v1472_v56 = vpop.f32.mrb[19].mxu0 }
 0x43e   :  { %1616 = shalt.err (!%p1613_p4)
}
 0x43f   :  { %s1617_s0 = scalar_lea.hbm %s2089_s3, 32 }
 0x440   :  { %p1618_p5 = scmp.ne.s32.totalorder %s2089_s3, %s1617_s0  ;;  %p1621_p6 = scmp.lt.u32.totalorder %s1617_s0, %s2089_s3 }
 0x442   :  { %p1623_p7 = pnand %p1621_p6, %p1618_p5 }
 0x444   :  { %1626 = shalt.err (!%p1623_p7)
}
 0x445   :  { %1187 = dma.vmem_to_hbm [thread:$0]  %s1185_s10, 32, %s2089_s3, [#allocation3]  }
 0x446   :  { %1627 = dma.done.wait [#allocation3], 32  }
 0x447   :  { %1628 = vsyncadd [#allocation3], 4294967264 }
 0x448   :  { %1191 = vsyncpa [#allocation3], 1 }

</bundles_post_ra>
